<compile_context>
chip_gen: v7x
topology: tpu7x:2x2x1
jax: 0.10.0
libtpu: 0.0.40
codegen_flags: <defaults>
</compile_context>

<pallas_src>
import jax
import jax.numpy as jnp
from jax.experimental import pallas as pl
from jax.experimental.pallas import tpu as pltpu


# ----------------------------------------------------------------------------
# Small helpers
# ----------------------------------------------------------------------------

def _round_up(x, m):
    return ((x + m - 1) // m) * m


def _device_kind():
    try:
        return jax.devices()[0].device_kind.lower()
    except Exception:  # best-effort: no device info -> conservative defaults
        return ""


def _vmem_capacity_bytes(kind):
    """Per-TensorCore VMEM capacity (best-effort query, conservative fallback)."""
    if hasattr(pltpu, "get_tpu_info"):
        try:
            cap = getattr(pltpu.get_tpu_info(), "vmem_capacity_bytes", None)
            if cap:
                return int(cap)
        except Exception:
            # Query is purely advisory; fall through to the table below.
            pass
    if "v7" in kind or "tpu7" in kind:
        return 64 * 1024 * 1024
    if "v2" in kind or "v3" in kind:
        return 16 * 1024 * 1024
    return 128 * 1024 * 1024   # v4 / v5e / v5p / v6e


def _auto_tuning(kind, compute_dtype):
    """Generation-aware defaults: (row tile, min row tiles, GELU dtype)."""
    is_v7 = ("v7" in kind) or ("tpu7" in kind)
    is_v5e = ("v5" in kind) and (("lite" in kind) or ("v5e" in kind))
    is_v6_plus = ("v6" in kind) or is_v7
    tm = 256 if is_v5e else 512
    # v7x shards the "parallel" grid axis across 2 TensorCores: make sure the
    # row axis has a few steps so neither core idles.
    min_row_tiles = 4 if is_v7 else 1
    # bf16 VPU/EUP exist on v6e/v7x only; keep GELU in f32 on v5e and older.
    if is_v6_plus and jnp.dtype(compute_dtype).itemsize == 2:
        gelu_dtype = jnp.dtype(compute_dtype)
    else:
        gelu_dtype = jnp.dtype(jnp.float32)
    return tm, min_row_tiles, gelu_dtype


def _vmem_estimate_bytes(tm, hp, td, x_bytes, out_bytes, c_bytes, needs_cast):
    est = 2 * tm * hp * x_bytes            # x row tile, double-buffered
    est += 2 * tm * hp * out_bytes         # output row tile, double-buffered
    est += 2 * (hp * td + td * hp) * c_bytes   # w1 + w2 D-blocks, double-buffered
    est += 2 * td * 4 + 2 * hp * 4         # b1 / b2 bias blocks (f32)
    est += tm * hp * 4                     # f32 accumulator scratch
    if needs_cast:
        est += tm * hp * c_bytes           # compute-dtype x scratch
    est += 2 * tm * td * 4                 # live f32 fc1/GELU intermediate + slack
    return est


# ----------------------------------------------------------------------------
# Kernel
# ----------------------------------------------------------------------------

def _make_kernel(*, needs_cast, approximate_gelu, gelu_dtype, compute_dtype):
    """Grid = (row tiles, D blocks).  D (mlp_dim) is the reduction axis."""

    def kernel(x_ref, w1_ref, b1_ref, w2_ref, b2_ref, o_ref, acc_ref, *scr):
        k = pl.program_id(1)

        if needs_cast:
            xb_ref = scr[0]

            @pl.when(k == 0)
            def _():
                # Cast the row tile to the MXU compute dtype once per tile
                # (not in the wrapper, not once per D block).
                xb_ref[...] = x_ref[...].astype(compute_dtype)
                acc_ref[...] = jnp.zeros_like(acc_ref)

            x = xb_ref[...]
        else:
            @pl.when(k == 0)
            def _():
                acc_ref[...] = jnp.zeros_like(acc_ref)

            x = x_ref[...]

        # fc1 on the MXU for this D block (f32 accumulation) + bias.
        h = jnp.dot(x, w1_ref[...], preferred_element_type=jnp.float32)
        h = h + b1_ref[...]

        # GELU.  Default: tanh approximation (EUP slot) in bf16 on v6e/v7x,
        # f32 on v5e.  approximate_gelu=False restores torch's exact erf.
        h = jax.nn.gelu(h.astype(gelu_dtype), approximate=approximate_gelu)

        # TODO(synk): training-mode dropout (pltpu.prng_seed +
        # pltpu.prng_random_bits masking) is not implemented; eval = identity.

        # fc2 partial product for this D block, accumulated in f32.
        acc_ref[...] += jnp.dot(h.astype(compute_dtype), w2_ref[...],
                                preferred_element_type=jnp.float32)

        @pl.when(k == pl.num_programs(1) - 1)
        def _():
            o_ref[...] = (acc_ref[...] + b2_ref[...]).astype(o_ref.dtype)

    return kernel


# ----------------------------------------------------------------------------
# Parameter preparation (call ONCE, outside the per-forward path)
# ----------------------------------------------------------------------------

def prepare_mlp_params(w1, b1, w2, b2, *, compute_dtype=jnp.bfloat16,
                       d_block=512):
    """Pad / cast fc1 & fc2 parameters to lane-aligned compute-dtype form.

    w1: (H, D) fc1 weight (in, out); b1: (D,); w2: (D, H); b2: (H,).
    Zero padding is mathematically inert (padded weight rows/cols and bias
    entries are zero, gelu(0)=0) and the wrapper slices the result back.
    """
    H, D = w1.shape
    assert w2.shape == (D, H) and b1.shape == (D,) and b2.shape == (H,)

    Hp = _round_up(H, 128)
    Dp = _round_up(D, 128)
    # Largest D-block <= d_block that is a multiple of 128 and divides Dp.
    tD = 128
    for cand in (512, 384, 256, 128):
        if cand <= d_block and cand <= Dp and Dp % cand == 0:
            tD = cand
            break

    compute_dtype = jnp.dtype(compute_dtype)
    w1p = w1.astype(compute_dtype)
    w2p = w2.astype(compute_dtype)
    b1p = b1.astype(jnp.float32).reshape(1, D)
    b2p = b2.astype(jnp.float32).reshape(1, H)
    if (Hp, Dp) != (H, D):
        w1p = jnp.pad(w1p, ((0, Hp - H), (0, Dp - D)))
        w2p = jnp.pad(w2p, ((0, Dp - D), (0, Hp - H)))
        b1p = jnp.pad(b1p, ((0, 0), (0, Dp - D)))
        b2p = jnp.pad(b2p, ((0, 0), (0, Hp - H)))

    return {"w1": w1p, "b1": b1p, "w2": w2p, "b2": b2p,
            "H": H, "D": D, "Hp": Hp, "Dp": Dp, "tD": tD,
            "compute_dtype": compute_dtype}


# ----------------------------------------------------------------------------
# Forward
# ----------------------------------------------------------------------------

def mlp_pallas(x, params, *, tm=None, min_row_tiles=None,
               approximate_gelu=True, gelu_dtype=None,
               vmem_budget_bytes=None):
    """ViT MLP forward: y = fc2(gelu(fc1(x))).  x: (B, S, H)."""
    B, S, H = x.shape
    assert H == params["H"], "hidden size mismatch with prepared params"
    Hp, Dp, tD = params["Hp"], params["Dp"], params["tD"]
    compute_dtype = params["compute_dtype"]
    M = B * S

    kind = _device_kind()
    auto_tm, auto_min_tiles, auto_gelu = _auto_tuning(kind, compute_dtype)
    if tm is None:
        tm = auto_tm
    if min_row_tiles is None:
        min_row_tiles = auto_min_tiles
    if gelu_dtype is None:
        gelu_dtype = auto_gelu
    gelu_dtype = jnp.dtype(gelu_dtype)

    cap = _vmem_capacity_bytes(kind)
    if vmem_budget_bytes is None:
        # ~60% of physical VMEM, capped at 48 MiB (so <= ~38 MiB on v7x).
        vmem_budget_bytes = min(48 * 1024 * 1024, int(0.60 * cap))

    x_bytes = jnp.dtype(x.dtype).itemsize
    out_bytes = x_bytes
    c_bytes = compute_dtype.itemsize
    needs_cast = jnp.dtype(x.dtype) != compute_dtype
    row_align = 16   # bf16 sublane packing for the compute-dtype tiles

    def est(tm_):
        return _vmem_estimate_bytes(tm_, Hp, tD, x_bytes, out_bytes,
                                    c_bytes, needs_cast)

    # Row tile: as large as requested, no larger than the (aligned) token
    # count, small enough for the VMEM budget, and with enough grid steps to
    # keep both TensorCores busy on v7x.
    tm = max(row_align, _round_up(min(tm, _round_up(M, row_align)), row_align))
    while tm > row_align and est(tm) > vmem_budget_bytes:
        tm = max(row_align, _round_up(tm // 2, row_align))
    while tm > row_align and pl.cdiv(M, tm) < min_row_tiles:
        tm = max(row_align, _round_up(tm // 2, row_align))

    Mp = _round_up(M, tm)
    nD = Dp // tD

    # Activations stay in their original dtype; pad (with zeros) only if the
    # shapes are not already aligned (for ViT-B/L/H they are, so this is a
    # pure reshape and no extra HBM pass happens).
    x2d = x.reshape(M, H)
    if (Mp, Hp) != (M, H):
        x2d = jnp.pad(x2d, ((0, Mp - M), (0, Hp - H)))

    vmem_limit = int(min(int(0.85 * cap),
                         max(32 * 1024 * 1024, int(1.5 * est(tm)))))

    kernel = _make_kernel(needs_cast=needs_cast,
                          approximate_gelu=approximate_gelu,
                          gelu_dtype=gelu_dtype,
                          compute_dtype=compute_dtype)

    scratch_shapes = [pltpu.VMEM((tm, Hp), jnp.float32)]     # f32 accumulator
    if needs_cast:
        scratch_shapes.append(pltpu.VMEM((tm, Hp), compute_dtype))

    out = pl.pallas_call(
        kernel,
        out_shape=jax.ShapeDtypeStruct((Mp, Hp), x.dtype),
        grid_spec=pltpu.PrefetchScalarGridSpec(
            num_scalar_prefetch=0,
            grid=(Mp // tm, nD),                    # reduction axis (D) last
            in_specs=[
                pl.BlockSpec((tm, Hp), lambda i, k: (i, 0)),   # x row tile
                pl.BlockSpec((Hp, tD), lambda i, k: (0, k)),   # w1 D-block
                pl.BlockSpec((1, tD), lambda i, k: (0, k)),    # b1 D-block
                pl.BlockSpec((tD, Hp), lambda i, k: (k, 0)),   # w2 D-block
                pl.BlockSpec((1, Hp), lambda i, k: (0, 0)),    # b2 (tiny)
            ],
            out_specs=pl.BlockSpec((tm, Hp), lambda i, k: (i, 0)),
            scratch_shapes=scratch_shapes,
        ),
        compiler_params=pltpu.CompilerParams(
            dimension_semantics=("parallel", "arbitrary"),
            vmem_limit_bytes=vmem_limit),
    )(x2d, params["w1"], params["b1"], params["w2"], params["b2"])

    if (Mp, Hp) != (M, H):
        out = out[:M, :H]
    return out.reshape(B, S, H)


# ----------------------------------------------------------------------------
# References & init helpers
# ----------------------------------------------------------------------------

def _xavier_uniform(key, fan_in, fan_out, dtype=jnp.float32):
    limit = (6.0 / (fan_in + fan_out)) ** 0.5
    return jax.random.uniform(key, (fan_in, fan_out), dtype,
                              minval=-limit, maxval=limit)


def mlp_reference_f32(x, w1, b1, w2, b2):
    """Full-f32, exact-erf GELU reference (the torch module's semantics)."""
    h = jnp.einsum("bsh,hd->bsd", x, w1) + b1
    h = jax.nn.gelu(h, approximate=False)
    return jnp.einsum("bsd,dh->bsh", h, w2) + b2


def mlp_reference_matched(x, w1, b1, w2, b2, *, compute_dtype, gelu_dtype,
                          approximate):
    """Reference using the same arithmetic as the kernel (bf16 MXU operands,
    f32 accumulation, same GELU dtype/approximation)."""
    xb = x.astype(compute_dtype)
    h = jnp.einsum("bsh,hd->bsd", xb, w1.astype(compute_dtype),
                   preferred_element_type=jnp.float32) + b1
    h = jax.nn.gelu(h.astype(gelu_dtype), approximate=approximate)
    y = jnp.einsum("bsd,dh->bsh", h.astype(compute_dtype),
                   w2.astype(compute_dtype),
                   preferred_element_type=jnp.float32) + b2
    return y.astype(x.dtype)


# ----------------------------------------------------------------------------
# Self-test
# ----------------------------------------------------------------------------

if __name__ == "__main__":
    # Small config consistent with the module: hidden_size=32, mlp_dim=64.
    B, S, H, D = 2, 8, 32, 64

    key = jax.random.PRNGKey(0)
    kx, kw1, kw2, kb1, kb2 = jax.random.split(key, 5)

    x = jax.random.normal(kx, (B, S, H), jnp.float32)

    # Deterministic init mirroring _init_weights:
    # xavier_uniform_ on weights, normal(std=1e-6) on biases.
    w1 = _xavier_uniform(kw1, H, D)                         # fc1: (in, out)
    b1 = 1e-6 * jax.random.normal(kb1, (D,), jnp.float32)
    w2 = _xavier_uniform(kw2, D, H)                         # fc2: (in, out)
    b2 = 1e-6 * jax.random.normal(kb2, (H,), jnp.float32)

    # Weight padding/casting happens once, outside the per-call path.
    params = prepare_mlp_params(w1, b1, w2, b2, compute_dtype=jnp.bfloat16)

    y = jax.block_until_ready(mlp_pallas(x, params))
    assert y.shape == (B, S, H)

    # Check against a reference using the exact same arithmetic as the kernel.
    kind = _device_kind()
    _, _, gelu_dt = _auto_tuning(kind, jnp.dtype(jnp.bfloat16))
    y_match = mlp_reference_matched(x, w1, b1, w2, b2,
                                    compute_dtype=jnp.bfloat16,
                                    gelu_dtype=gelu_dt, approximate=True)
    assert jnp.allclose(y, y_match, atol=2e-2, rtol=2e-2), \
        "mismatch vs matched-arithmetic reference"

    # ... and against the full-f32 erf reference with bf16-appropriate tol.
    y_f32 = mlp_reference_f32(x, w1, b1, w2, b2)
    assert jnp.allclose(y, y_f32, atol=5e-2, rtol=5e-2), \
        "mismatch vs f32 reference"

    print("KERNEL_OK")
</pallas_src>

<mosaic_0001>
module attributes {stable_mosaic.version = 11 : i64} {
  func.func @kernel(%arg0: i32, %arg1: i32, %arg2: memref<16x128xf32, #tpu.memory_space<vmem>>, %arg3: memref<128x128xbf16, #tpu.memory_space<vmem>>, %arg4: memref<1x128xf32, #tpu.memory_space<vmem>>, %arg5: memref<128x128xbf16, #tpu.memory_space<vmem>>, %arg6: memref<1x128xf32, #tpu.memory_space<vmem>>, %arg7: memref<16x128xf32, #tpu.memory_space<vmem>>, %arg8: memref<16x128xf32, #tpu.memory_space<vmem>>, %arg9: memref<16x128xbf16, #tpu.memory_space<vmem>>) attributes {dimension_semantics = [#tpu.dimension_semantics<parallel>, #tpu.dimension_semantics<arbitrary>], iteration_bounds = array<i64: 1, 1>, scalar_prefetch = 0 : i64, scratch_operands = 2 : i64, tpu.core_type = #tpu.core_type<tc>, window_params = [{transform_indices = @transform_0, window_bounds = array<i64: 16, 128>}, {transform_indices = @transform_1, window_bounds = array<i64: 128, 128>}, {transform_indices = @transform_2, window_bounds = array<i64: 1, 128>}, {transform_indices = @transform_3, window_bounds = array<i64: 128, 128>}, {pipeline_mode = #tpu.pipeline_mode<synchronous>, transform_indices = @transform_4, window_bounds = array<i64: 1, 128>}, {transform_indices = @transform_5, window_bounds = array<i64: 16, 128>}]} {
    %c0_i32 = arith.constant 0 : i32
    %0 = arith.cmpi eq, %arg1, %c0_i32 : i32
    %1 = arith.extui %0 : i1 to i32
    %c0_i32_0 = arith.constant 0 : i32
    %2 = arith.cmpi ne, %1, %c0_i32_0 : i32
    scf.if %2 {
      %c0_19 = arith.constant 0 : index
      %c0_20 = arith.constant 0 : index
      %31 = vector.load %arg2[%c0_19, %c0_20] : memref<16x128xf32, #tpu.memory_space<vmem>>, vector<16x128xf32>
      %32 = arith.truncf %31 : vector<16x128xf32> to vector<16x128xbf16>
      %c0_21 = arith.constant 0 : index
      %c0_22 = arith.constant 0 : index
      %33 = vector.load %arg9[%c0_21, %c0_22] : memref<16x128xbf16, #tpu.memory_space<vmem>>, vector<16x128xbf16>
      tpu.vector_store %arg9[%c0_21, %c0_22], %32 {strides = array<i32>} : memref<16x128xbf16, #tpu.memory_space<vmem>>, vector<16x128xbf16>,
      %cst_23 = arith.constant 0.000000e+00 : f32
      %34 = vector.broadcast %cst_23 : f32 to vector<16x128xf32>
      %c0_24 = arith.constant 0 : index
      %c0_25 = arith.constant 0 : index
      %35 = vector.load %arg8[%c0_24, %c0_25] : memref<16x128xf32, #tpu.memory_space<vmem>>, vector<16x128xf32>
      tpu.vector_store %arg8[%c0_24, %c0_25], %34 {strides = array<i32>} : memref<16x128xf32, #tpu.memory_space<vmem>>, vector<16x128xf32>,
    } else {
    }
    %c0 = arith.constant 0 : index
    %c0_1 = arith.constant 0 : index
    %3 = vector.load %arg9[%c0, %c0_1] : memref<16x128xbf16, #tpu.memory_space<vmem>>, vector<16x128xbf16>
    %c0_2 = arith.constant 0 : index
    %c0_3 = arith.constant 0 : index
    %4 = vector.load %arg3[%c0_2, %c0_3] : memref<128x128xbf16, #tpu.memory_space<vmem>>, vector<128x128xbf16>
    %cst = arith.constant dense<0.000000e+00> : vector<16x128xf32>
    %5 = tpu.matmul %3, %4, %cst {dimension_numbers = #tpu.dot_dimension_numbers<[1], [0], [0], [1], [0, 0, 1, 1], [], []>} : vector<16x128xbf16>, vector<128x128xbf16>, vector<16x128xf32> -> vector<16x128xf32>
    %c0_4 = arith.constant 0 : index
    %c0_5 = arith.constant 0 : index
    %6 = vector.load %arg4[%c0_4, %c0_5] : memref<1x128xf32, #tpu.memory_space<vmem>>, vector<1x128xf32>
    %7 = vector.broadcast %6 : vector<1x128xf32> to vector<16x128xf32>
    %8 = arith.addf %5, %7 : vector<16x128xf32>
    %9 = arith.mulf %8, %8 : vector<16x128xf32>
    %10 = arith.mulf %8, %9 : vector<16x128xf32>
    %cst_6 = arith.constant 4.471500e-02 : f32
    %11 = vector.broadcast %cst_6 : f32 to vector<16x128xf32>
    %12 = arith.mulf %11, %10 : vector<16x128xf32>
    %13 = arith.addf %8, %12 : vector<16x128xf32>
    %cst_7 = arith.constant 0.797884583 : f32
    %14 = vector.broadcast %cst_7 : f32 to vector<16x128xf32>
    %15 = arith.mulf %14, %13 : vector<16x128xf32>
    %16 = math.tanh %15 : vector<16x128xf32>
    %cst_8 = arith.constant 1.000000e+00 : f32
    %17 = vector.broadcast %cst_8 : f32 to vector<16x128xf32>
    %18 = arith.addf %17, %16 : vector<16x128xf32>
    %cst_9 = arith.constant 5.000000e-01 : f32
    %19 = vector.broadcast %cst_9 : f32 to vector<16x128xf32>
    %20 = arith.mulf %19, %18 : vector<16x128xf32>
    %21 = arith.mulf %8, %20 : vector<16x128xf32>
    %c0_10 = arith.constant 0 : index
    %c0_11 = arith.constant 0 : index
    %22 = vector.load %arg8[%c0_10, %c0_11] : memref<16x128xf32, #tpu.memory_space<vmem>>, vector<16x128xf32>
    %23 = arith.truncf %21 : vector<16x128xf32> to vector<16x128xbf16>
    %c0_12 = arith.constant 0 : index
    %c0_13 = arith.constant 0 : index
    %24 = vector.load %arg5[%c0_12, %c0_13] : memref<128x128xbf16, #tpu.memory_space<vmem>>, vector<128x128xbf16>
    %cst_14 = arith.constant dense<0.000000e+00> : vector<16x128xf32>
    %25 = tpu.matmul %23, %24, %cst_14 {dimension_numbers = #tpu.dot_dimension_numbers<[1], [0], [0], [1], [0, 0, 1, 1], [], []>} : vector<16x128xbf16>, vector<128x128xbf16>, vector<16x128xf32> -> vector<16x128xf32>
    %26 = arith.addf %22, %25 : vector<16x128xf32>
    %c0_15 = arith.constant 0 : index
    %c0_16 = arith.constant 0 : index
    %27 = vector.load %arg8[%c0_15, %c0_16] : memref<16x128xf32, #tpu.memory_space<vmem>>, vector<16x128xf32>
    tpu.vector_store %arg8[%c0_15, %c0_16], %26 {strides = array<i32>} : memref<16x128xf32, #tpu.memory_space<vmem>>, vector<16x128xf32>,
    %c0_i32_17 = arith.constant 0 : i32
    %28 = arith.cmpi eq, %arg1, %c0_i32_17 : i32
    %29 = arith.extui %28 : i1 to i32
    %c0_i32_18 = arith.constant 0 : i32
    %30 = arith.cmpi ne, %29, %c0_i32_18 : i32
    scf.if %30 {
      %c0_19 = arith.constant 0 : index
      %c0_20 = arith.constant 0 : index
      %31 = vector.load %arg8[%c0_19, %c0_20] : memref<16x128xf32, #tpu.memory_space<vmem>>, vector<16x128xf32>
      %c0_21 = arith.constant 0 : index
      %c0_22 = arith.constant 0 : index
      %32 = vector.load %arg6[%c0_21, %c0_22] : memref<1x128xf32, #tpu.memory_space<vmem>>, vector<1x128xf32>
      %33 = vector.broadcast %32 : vector<1x128xf32> to vector<16x128xf32>
      %34 = arith.addf %31, %33 : vector<16x128xf32>
      %c0_23 = arith.constant 0 : index
      %c0_24 = arith.constant 0 : index
      %35 = vector.load %arg7[%c0_23, %c0_24] : memref<16x128xf32, #tpu.memory_space<vmem>>, vector<16x128xf32>
      tpu.vector_store %arg7[%c0_23, %c0_24], %34 {strides = array<i32>} : memref<16x128xf32, #tpu.memory_space<vmem>>, vector<16x128xf32>,
    } else {
    }
    return
  }
  func.func @transform_0(%arg0: i32, %arg1: i32) -> (i32, i32) {
    %c0_i32 = arith.constant 0 : i32
    %c0_i32_0 = arith.constant 0 : i32
    return %arg0, %c0_i32 : i32, i32
  }
  func.func @transform_1(%arg0: i32, %arg1: i32) -> (i32, i32) {
    %c0_i32 = arith.constant 0 : i32
    %c0_i32_0 = arith.constant 0 : i32
    return %c0_i32, %arg1 : i32, i32
  }
  func.func @transform_2(%arg0: i32, %arg1: i32) -> (i32, i32) {
    %c0_i32 = arith.constant 0 : i32
    %c0_i32_0 = arith.constant 0 : i32
    return %c0_i32, %arg1 : i32, i32
  }
  func.func @transform_3(%arg0: i32, %arg1: i32) -> (i32, i32) {
    %c0_i32 = arith.constant 0 : i32
    %c0_i32_0 = arith.constant 0 : i32
    return %arg1, %c0_i32 : i32, i32
  }
  func.func @transform_4(%arg0: i32, %arg1: i32) -> (i32, i32) {
    %c0_i32 = arith.constant 0 : i32
    %c0_i32_0 = arith.constant 0 : i32
    %c0_i32_1 = arith.constant 0 : i32
    return %c0_i32, %c0_i32_0 : i32, i32
  }
  func.func @transform_5(%arg0: i32, %arg1: i32) -> (i32, i32) {
    %c0_i32 = arith.constant 0 : i32
    %c0_i32_0 = arith.constant 0 : i32
    return %arg0, %c0_i32 : i32, i32
  }
}

</mosaic_0001>

<bundles_post_ra>
// kernel: tpu_custom_call.1
= control target key start
LH: loop header
LB: loop body
LE: loop exit
PB: predicated region body
PF: predicated region fallthrough
CT: control target
= control target key end

     0   :  { %10 = vsyncpa [#allocation5], 0  ;;  %s656_s0 = inlined_call_operand.hbm [shape: f32[16,128], index: 0, kind: input, shape index: {}]   ;;  %s657_s1 = inlined_call_operand.hbm [shape: bf16[128,128], index: 1, kind: input, shape index: {}]   ;;  %s658_s2 = inlined_call_operand.vmem [shape: f32[1,128], index: 2, kind: input, shape index: {}]   ;;  %s659_s3 = inlined_call_operand.hbm [shape: bf16[128,128], index: 3, kind: input, shape index: {}]   ;;  %s660_s4 = inlined_call_operand.vmem [shape: f32[1,128], index: 4, kind: input, shape index: {}]   ;;  %s661_s5 = inlined_call_operand.hbm [shape: f32[16,128], index: 5, kind: output, shape index: {}]  }
   0x1   :  { %11 = vsyncpa [#allocation8], 0 }
   0x2   :  { %12 = vsyncpa [#allocation6], 0  ;;  %s550_s18 = smov [#allocation7]   ;;  %s456_s22 = scalar_lea.hbm %s657_s1, 1024 }
   0x3   :  { %s30_s19 = sshll.u32 %s550_s18, 4  ;;  %p457_p0 = scmp.ne.s32.totalorder %s657_s1, %s456_s22  ;;  %s31_s19 = int_to_ptr.vmem [resolvable:$true] %s30_s19 }
   0x4   :  { %p460_p1 = scmp.lt.u32.totalorder %s456_s22, %s657_s1 }
   0x6   :  { %p462_p2 = pnand %p460_p1, %p457_p0 }
   0x8   :  { %465 = shalt.err (!%p462_p2)
}
   0x9   :  { %s466_s27 = scalar_lea.vmem %s31_s19, 1024  ;;  %p471_p4 = scmp.lt.s32.totalorder %s31_s19, %s31_s19 }
   0xa   :  { %p467_p3 = scmp.ne.s32.totalorder %s31_s19, %s466_s27  ;;  %p472_p5 = scmp.lt.s32.totalorder %s466_s27, %s466_s27 }
   0xc   :  { %p473_p6 = por %p472_p5, %p471_p4 }
   0xe   :  { %p474_p7 = pnand %p473_p6, %p467_p3 }
  0x10   :  { %477 = shalt.err (!%p474_p7)
}
  0x11   :  { %s551_s28 = smov 64   ;;  %s552_s29 = smov 4  }
  0x12   :  { %36 = dma.hbm_to_vmem [thread:$0]  %s657_s1, 1024, %s31_s19, [#allocation8], %s551_s28, %s551_s28, %s552_s29  }
  0x13   :  { %s553_s7 = smov [#allocation4]   ;;  %s478_s11 = scalar_lea.hbm %s656_s0, 256 }
  0x14   :  { %s18_s8 = sshll.u32 %s553_s7, 4  ;;  %p479_p8 = scmp.ne.s32.totalorder %s656_s0, %s478_s11  ;;  %s19_s8 = int_to_ptr.vmem [resolvable:$true] %s18_s8 }
  0x15   :  { %p482_p9 = scmp.lt.u32.totalorder %s478_s11, %s656_s0 }
  0x17   :  { %p484_p10 = pnand %p482_p9, %p479_p8 }
  0x19   :  { %487 = shalt.err (!%p484_p10)
}
  0x1a   :  { %s488_s16 = scalar_lea.vmem %s19_s8, 256  ;;  %p493_p12 = scmp.lt.s32.totalorder %s19_s8, %s19_s8 }
  0x1b   :  { %p489_p11 = scmp.ne.s32.totalorder %s19_s8, %s488_s16  ;;  %p494_p13 = scmp.lt.s32.totalorder %s488_s16, %s488_s16 }
  0x1d   :  { %p495_p0 = por %p494_p13, %p493_p12 }
  0x1f   :  { %p496_p1 = pnand %p495_p0, %p489_p11 }
  0x21   :  { %499 = shalt.err (!%p496_p1)
}
  0x22   :  { %s554_s1 = smov 128   ;;  %s555_s17 = smov 8  }
  0x23   :  { %24 = dma.hbm_to_vmem [thread:$0]  %s656_s0, 256, %s19_s8, [#allocation5], %s554_s1, %s554_s1, %s555_s17  }
  0x24   :  { %s556_s20 = smov [#allocation9]   ;;  %s500_s24 = scalar_lea.hbm %s659_s3, 1024 }
  0x25   :  { %s44_s21 = sshll.u32 %s556_s20, 4  ;;  %p501_p2 = scmp.ne.s32.totalorder %s659_s3, %s500_s24  ;;  %s45_s21 = int_to_ptr.vmem [resolvable:$true] %s44_s21 }
  0x26   :  { %p504_p3 = scmp.lt.u32.totalorder %s500_s24, %s659_s3 }
  0x28   :  { %p506_p4 = pnand %p504_p3, %p501_p2 }
  0x2a   :  { %509 = shalt.err (!%p506_p4)
}
  0x2b   :  { %s510_s6 = scalar_lea.vmem %s45_s21, 1024  ;;  %p515_p6 = scmp.lt.s32.totalorder %s45_s21, %s45_s21 }
  0x2c   :  { %p511_p5 = scmp.ne.s32.totalorder %s45_s21, %s510_s6  ;;  %p516_p7 = scmp.lt.s32.totalorder %s510_s6, %s510_s6 }
  0x2e   :  { %p517_p8 = por %p516_p7, %p515_p6 }
  0x30   :  { %p518_p9 = pnand %p517_p8, %p511_p5 }
  0x32   :  { %521 = shalt.err (!%p518_p9)
}
  0x33   :  { %50 = dma.hbm_to_vmem [thread:$0]  %s659_s3, 1024, %s45_s21, [#allocation8], %s551_s28, %s551_s28, %s552_s29  }
  0x34   :  { %544 = dma.done.wait [#allocation5], 256  }
  0x35   :  { %545 = vsyncadd [#allocation5], 4294967040 }
  0x36   :  { %546 = dma.done.wait [#allocation8], 2048  }
  0x37   :  { %547 = vsyncadd [#allocation8], 4294965248  ;;  %v557_v0 = vmov 0.0   ;;  %vm558_vm0 = vmmov 0   ;;  %v436_v1 = vld [vmem:[#allocation7] sm:$0xff]   ;;  %v437_v2 = vld [vmem:[#allocation7 + $0x8] sm:$0xff]  }
  0x38   :  { %386 = vmatprep.subr.bf16.mxu0 %v557_v0  ;;  %402 = vmatprep.mubr.msk.bf16.mxu0 %vm558_vm0, %v557_v0  ;;  %v438_v3 = vld [vmem:[#allocation7 + $0x10] sm:$0xff]   ;;  %v439_v4 = vld [vmem:[#allocation7 + $0x18] sm:$0xff]   ;;  %v440_v5 = vld [vmem:[#allocation7 + $0x20] sm:$0xff]   ;;  %s559_s8 = smov [#allocation10]  }
  0x39   :  { %406 = vmatprep.subr.bf16.mxu1 %v557_v0  ;;  %422 = vmatprep.mubr.msk.bf16.mxu1 %vm558_vm0, %v557_v0  ;;  %v441_v6 = vld [vmem:[#allocation7 + $0x28] sm:$0xff]   ;;  %v442_v7 = vld [vmem:[#allocation7 + $0x30] sm:$0xff]   ;;  %v443_v8 = vld [vmem:[#allocation7 + $0x38] sm:$0xff]   ;;  %s337_s9 = sshll.u32 %s559_s8, 4  ;;  %s338_s9 = int_to_ptr.vmem [resolvable:$true] %s337_s9 }
  0x3a   :  { %387 = vmatpush3.bf16.msra.mxu0 %v436_v1  ;;  %v67_v9 = vld [vmem:[#allocation4] sm:$0xff]  ;;  %v68_v10 = vld [vmem:[#allocation4 + $0x8] sm:$0xff]  ;;  %v444_v12 = vld [vmem:[#allocation9] sm:$0xff]   ;;  %s522_s10 = scalar_lea.vmem %s338_s9, 256  ;;  %p527_p11 = scmp.lt.s32.totalorder %s338_s9, %s338_s9 }
  0x3b   :  { %388 = vmatprep.subr.bf16.mxu0 %v557_v0  ;;  %v69_v11 = vpack.c.bf16 %v68_v10, %v67_v9  ;;  %407 = vmatpush3.bf16.msra.mxu1 %v444_v12  ;;  %v445_v13 = vld [vmem:[#allocation9 + $0x8] sm:$0xff]   ;;  %v446_v14 = vld [vmem:[#allocation9 + $0x10] sm:$0xff]   ;;  %v447_v15 = vld [vmem:[#allocation9 + $0x18] sm:$0xff]   ;;  %p523_p10 = scmp.ne.s32.totalorder %s338_s9, %s522_s10  ;;  %p528_p12 = scmp.lt.s32.totalorder %s522_s10, %s522_s10 }
  0x3c   :  { %408 = vmatprep.subr.bf16.mxu1 %v557_v0  ;;  %v448_v16 = vld [vmem:[#allocation9 + $0x20] sm:$0xff]   ;;  %v449_v17 = vld [vmem:[#allocation9 + $0x28] sm:$0xff]   ;;  %v450_v18 = vld [vmem:[#allocation9 + $0x30] sm:$0xff]  }
  0x3d   :  { %v451_v19 = vld [vmem:[#allocation9 + $0x38] sm:$0xff]   ;;  %v350_v20 = vld [vmem:[%s658_s2] ss:$0 sm:$0xff]  ;;  %p529_p13 = por %p528_p12, %p527_p11 }
  0x3e   :  { %389 = vmatpush3.bf16.msra.mxu0 %v437_v2  ;;  %v367_v46 = vld [vmem:[%s660_s4] ss:$0 sm:$0xff] }
  0x3f   :  { %390 = vmatprep.subr.bf16.mxu0 %v557_v0  ;;  %409 = vmatpush3.bf16.msra.mxu1 %v445_v13  ;;  %p530_p0 = pnand %p529_p13, %p523_p10 }
  0x40   :  { %410 = vmatprep.subr.bf16.mxu1 %v557_v0 }
  0x42   :  { %391 = vmatpush3.bf16.msra.mxu0 %v438_v3 }
  0x43   :  { %392 = vmatprep.subr.bf16.mxu0 %v557_v0  ;;  %411 = vmatpush3.bf16.msra.mxu1 %v446_v14 }
  0x44   :  { %412 = vmatprep.subr.bf16.mxu1 %v557_v0 }
  0x46   :  { %393 = vmatpush3.bf16.msra.mxu0 %v439_v4 }
  0x47   :  { %394 = vmatprep.subr.bf16.mxu0 %v557_v0  ;;  %413 = vmatpush3.bf16.msra.mxu1 %v447_v15 }
  0x48   :  { %414 = vmatprep.subr.bf16.mxu1 %v557_v0 }
  0x4a   :  { %395 = vmatpush3.bf16.msra.mxu0 %v440_v5 }
  0x4b   :  { %396 = vmatprep.subr.bf16.mxu0 %v557_v0  ;;  %415 = vmatpush3.bf16.msra.mxu1 %v448_v16 }
  0x4c   :  { %416 = vmatprep.subr.bf16.mxu1 %v557_v0 }
  0x4e   :  { %397 = vmatpush3.bf16.msra.mxu0 %v441_v6 }
  0x4f   :  { %398 = vmatprep.subr.bf16.mxu0 %v557_v0  ;;  %417 = vmatpush3.bf16.msra.mxu1 %v449_v17 }
  0x50   :  { %418 = vmatprep.subr.bf16.mxu1 %v557_v0 }
  0x52   :  { %399 = vmatpush3.bf16.msra.mxu0 %v442_v7 }
  0x53   :  { %400 = vmatprep.subr.bf16.mxu0 %v557_v0  ;;  %419 = vmatpush3.bf16.msra.mxu1 %v450_v18 }
  0x54   :  { %420 = vmatprep.subr.bf16.mxu1 %v557_v0 }
  0x56   :  { %401 = vmatpush3.bf16.msra.mxu0 %v443_v8 }
  0x57   :  { %421 = vmatpush3.bf16.msra.mxu1 %v451_v19 }
  0x59   :  { %403 = vmatmul.mubr.bf16.vlgmr.msra.gmra.mrb[0].mxu0 %v69_v11 }
 0x12c   :  { %v179_v21 = vpop.f32.mrb[0].mxu0 }
 0x12d   :  { %v180_v22 = vadd.f32 %v350_v20, %v179_v21  ;;  %v404_v23 = vpop.f32.mrb[1].mxu0 }
 0x12e   :  { %v182_v24 = vpop.f32.mrb[2].mxu0 }
 0x12f   :  { %v186_v25 = vmul.f32 %v180_v22, %v180_v22  ;;  %v183_v26 = vadd.f32 %v350_v20, %v182_v24  ;;  %v405_v27 = vpop.f32.mrb[3].mxu0 }
 0x131   :  { %v188_v28 = vmul.f32 %v186_v25, %v180_v22  ;;  %v187_v29 = vmul.f32 %v183_v26, %v183_v26 }
 0x133   :  { %v190_v30 = vmul.f32 0.044715, %v188_v28  ;;  %v189_v31 = vmul.f32 %v187_v29, %v183_v26 }
 0x135   :  { %v192_v32 = vadd.f32 %v190_v30, %v180_v22  ;;  %v191_v33 = vmul.f32 0.044715, %v189_v31 }
 0x137   :  { %v194_v34 = vmul.f32 0.7978846, %v192_v32  ;;  %v193_v35 = vadd.f32 %v191_v33, %v183_v26 }
 0x139   :  { %452 = vtanh.f32 %v194_v34  ;;  %v195_v36 = vmul.f32 0.7978846, %v193_v35 }
 0x13b   :  { %454 = vtanh.f32 %v195_v36 }
 0x143   :  { %v453_v37 = vpop.eup %452 }
 0x144   :  { %v198_v38 = vadd.f32 1.0, %v453_v37 }
 0x145   :  { %v455_v39 = vpop.eup %454 }
 0x146   :  { %v199_v40 = vadd.f32 1.0, %v455_v39  ;;  %v200_v41 = vmul.f32 0.5, %v198_v38 }
 0x148   :  { %v201_v42 = vmul.f32 0.5, %v199_v40  ;;  %v202_v43 = vmul.f32 %v200_v41, %v180_v22 }
 0x14a   :  { %v203_v44 = vmul.f32 %v201_v42, %v183_v26 }
 0x14c   :  { %v206_v45 = vpack.c.bf16 %v203_v44, %v202_v43 }
 0x14e   :  { %423 = vmatmul.mubr.bf16.vlgmr.msra.gmra.mrb[0].mxu1 %v206_v45 }
 0x221   :  { %v305_v47 = vpop.f32.mrb[0].mxu1 }
 0x222   :  { %v328_v48 = vadd.f32 %v367_v46, %v305_v47  ;;  %v424_v49 = vpop.f32.mrb[1].mxu1 }
 0x223   :  { %v308_v50 = vpop.f32.mrb[2].mxu1 }
 0x224   :  { %330 = vst [vmem:[#allocation10] sm:$0xff] %v328_v48  ;;  %v329_v51 = vadd.f32 %v367_v46, %v308_v50  ;;  %v425_v52 = vpop.f32.mrb[3].mxu1 }
 0x226   :  { %331 = vst [vmem:[#allocation10 + $0x8] sm:$0xff] %v329_v51 }
 0x227   :  { %533 = shalt.err (!%p530_p0)
}
 0x228   :  { %s534_s12 = scalar_lea.hbm %s661_s5, 256 }
 0x229   :  { %p535_p1 = scmp.ne.s32.totalorder %s661_s5, %s534_s12  ;;  %p538_p2 = scmp.lt.u32.totalorder %s534_s12, %s661_s5 }
 0x22b   :  { %p540_p3 = pnand %p538_p2, %p535_p1 }
 0x22d   :  { %543 = shalt.err (!%p540_p3)
}
 0x22e   :  { %343 = dma.vmem_to_hbm [thread:$0]  %s338_s9, 256, %s661_s5, [#allocation6], %s554_s1, %s554_s1, %s555_s17  }
 0x22f   :  { %548 = dma.done.wait [#allocation6], 256  }
 0x230   :  { %549 = vsyncadd [#allocation6], 4294967040 }
 0x231   :  { %347 = vsyncpa [#allocation5], 1 }
 0x232   :  { %348 = vsyncpa [#allocation8], 1 }
 0x233   :  { %349 = vsyncpa [#allocation6], 1 }

</bundles_post_ra>
